<compile_context>
chip_gen: v5e
topology: v5e:2x2
jax: 0.10.0
libtpu: 0.0.40
codegen_flags: <defaults>
</compile_context>

<pallas_src>
import jax
import jax.numpy as jnp
from jax.experimental import pallas as pl
from jax.experimental.pallas import tpu as pltpu


def _pad_rows_kernel(x_ref, o_ref):
    """Copy valid frames into the left of the output tile, zero only the tail."""
    t = x_ref.shape[-1]           # static: input frame count
    nf = o_ref.shape[-1]          # static: padded frame count
    # Store pass 1: the copy (lane-dense over the valid region).
    o_ref[:, :t] = x_ref[...]
    # Store pass 2: only the pad tail — skipped entirely at trace time if no pad.
    if t < nf:
        o_ref[:, t:] = jnp.zeros((o_ref.shape[0], nf - t), dtype=o_ref.dtype)


def _choose_row_block(n_rows: int, n_frames: int, itemsize: int) -> int:
    """Pick a row-tile size: multiple of the sublane packing, ~2 MiB per block.

    2 MiB output blocks (+ similarly sized input blocks), double-buffered,
    stay comfortably under the 32 MiB scoped-VMEM default even on v7x
    (64 MiB physical), while being large enough to run near HBM roofline.
    """
    packing = 8 * max(1, 4 // itemsize)        # 8 rows/vreg f32, 16 bf16, 32 int8
    if n_rows <= packing:
        return n_rows                           # full dim — always a legal block
    target_bytes = 2 * 1024 * 1024
    rows = max(1, target_bytes // max(1, n_frames * itemsize))
    rows = max(packing, (rows // packing) * packing)
    return min(rows, n_rows)


def pad_frames_pallas(x: jax.Array, n_frames: int) -> jax.Array:
    """Right-pad the last axis of x with zeros to length n_frames (Pallas path)."""
    t = x.shape[-1]
    if t > n_frames:
        raise ValueError(f"n_frames ({n_frames}) must be >= input frames ({t})")

    lead = x.shape[:-1]
    n_rows = 1
    for d in lead:
        n_rows *= d

    x2 = x.reshape(n_rows, t)                  # sublane-dense row layout
    itemsize = jnp.dtype(x.dtype).itemsize
    block_r = _choose_row_block(n_rows, n_frames, itemsize)
    grid = (pl.cdiv(n_rows, block_r),)

    out = pl.pallas_call(
        _pad_rows_kernel,
        out_shape=jax.ShapeDtypeStruct((n_rows, n_frames), x.dtype),
        grid_spec=pltpu.PrefetchScalarGridSpec(
            num_scalar_prefetch=0,
            grid=grid,
            in_specs=[pl.BlockSpec((block_r, t), lambda i: (i, 0))],
            out_specs=pl.BlockSpec((block_r, n_frames), lambda i: (i, 0)),
        ),
        compiler_params=pltpu.CompilerParams(
            # Row blocks are independent: lets v7x shard the grid across its
            # 2 TensorCores; harmless on v5e/v6e.
            dimension_semantics=("parallel",),
        ),
    )(x2)
    return out.reshape(*lead, n_frames)


# Below this many output elements, launch/grid-step overhead dwarfs the copy
# and XLA can fuse jnp.pad into neighbors — don't use the kernel.
_PALLAS_MIN_OUT_ELEMS = 64 * 1024


def pad_frames(x: jax.Array, n_frames: int, *, force_pallas: bool = False) -> jax.Array:
    """Pad.forward: right-pad last axis with zeros up to n_frames."""
    lead_elems = 1
    for d in x.shape[:-1]:
        lead_elems *= d
    if not force_pallas and lead_elems * n_frames < _PALLAS_MIN_OUT_ELEMS:
        pad_cfg = [(0, 0)] * (x.ndim - 1) + [(0, n_frames - x.shape[-1])]
        return jnp.pad(x, pad_cfg)
    return pad_frames_pallas(x, n_frames)


if __name__ == "__main__":
    n_frames = 32
    key = jax.random.PRNGKey(0)

    # Small input consistent with the forward: (B, C, T) with T < n_frames.
    x = jax.random.normal(key, (2, 4, 16), dtype=jnp.float32)
    out = jax.block_until_ready(pad_frames(x, n_frames, force_pallas=True))
    ref = jnp.pad(x, ((0, 0), (0, 0), (0, n_frames - x.shape[-1])))
    assert out.shape == (2, 4, n_frames)
    assert out.dtype == x.dtype
    assert jnp.array_equal(out, ref)

    # Slightly larger check: non-128-multiple T boundary, zero-pad tail > T.
    x2 = jax.random.normal(jax.random.PRNGKey(0), (4, 8, 250), dtype=jnp.float32)
    out2 = jax.block_until_ready(pad_frames(x2, 512, force_pallas=True))
    ref2 = jnp.pad(x2, ((0, 0), (0, 0), (0, 512 - 250)))
    assert jnp.array_equal(out2, ref2)

    # No-pad edge case (T == n_frames) goes through the same kernel (copy only).
    out3 = jax.block_until_ready(pad_frames(ref2, 512, force_pallas=True))
    assert jnp.array_equal(out3, ref2)

    print("KERNEL_OK")
</pallas_src>

<mosaic_0001>
module attributes {stable_mosaic.version = 11 : i64} {
  func.func @_pad_rows_kernel(%arg0: i32, %arg1: memref<8x16xf32, #tpu.memory_space<vmem>>, %arg2: memref<8x32xf32, #tpu.memory_space<vmem>>) attributes {dimension_semantics = [#tpu.dimension_semantics<parallel>], iteration_bounds = array<i64: 1>, scalar_prefetch = 0 : i64, scratch_operands = 0 : i64, tpu.core_type = #tpu.core_type<tc>, window_params = [{transform_indices = @transform_0, window_bounds = array<i64: 8, 16>}, {transform_indices = @transform_1, window_bounds = array<i64: 8, 32>}]} {
    %c0 = arith.constant 0 : index
    %c0_0 = arith.constant 0 : index
    %0 = vector.load %arg1[%c0, %c0_0] : memref<8x16xf32, #tpu.memory_space<vmem>>, vector<8x16xf32>
    %c0_1 = arith.constant 0 : index
    %c0_2 = arith.constant 0 : index
    %1 = vector.load %arg2[%c0_1, %c0_2] : memref<8x32xf32, #tpu.memory_space<vmem>>, vector<8x16xf32>
    tpu.vector_store %arg2[%c0_1, %c0_2], %0 {strides = array<i32>} : memref<8x32xf32, #tpu.memory_space<vmem>>, vector<8x16xf32>,
    %cst = arith.constant 0.000000e+00 : f32
    %2 = vector.broadcast %cst : f32 to vector<8x16xf32>
    %c0_3 = arith.constant 0 : index
    %c16 = arith.constant 16 : index
    %3 = vector.load %arg2[%c0_3, %c16] : memref<8x32xf32, #tpu.memory_space<vmem>>, vector<8x16xf32>
    tpu.vector_store %arg2[%c0_3, %c16], %2 {strides = array<i32>} : memref<8x32xf32, #tpu.memory_space<vmem>>, vector<8x16xf32>,
    return
  }
  func.func @transform_0(%arg0: i32) -> (i32, i32) {
    %c0_i32 = arith.constant 0 : i32
    %c0_i32_0 = arith.constant 0 : i32
    return %arg0, %c0_i32 : i32, i32
  }
  func.func @transform_1(%arg0: i32) -> (i32, i32) {
    %c0_i32 = arith.constant 0 : i32
    %c0_i32_0 = arith.constant 0 : i32
    return %arg0, %c0_i32 : i32, i32
  }
}

</mosaic_0001>

<bundles_post_ra>
// kernel: tpu_custom_call.1
= control target key start
LH: loop header
LB: loop body
LE: loop exit
PB: predicated region body
PF: predicated region fallthrough
CT: control target
= control target key end

     0   :  { %6 = vsyncpa [#allocation3], 0  ;;  %s119_s0 = inlined_call_operand.hbm [shape: f32[8,16], index: 0, kind: input, shape index: {}]   ;;  %s120_s1 = inlined_call_operand.hbm [shape: f32[8,32], index: 1, kind: output, shape index: {}]  }
   0x1   :  { %7 = vsyncpa [#allocation4], 0  ;;  %s13_s8 = sshll.u32 %s119_s0, 4  ;;  %s100_s9 = smov [#allocation2]   ;;  %s14_s8 = int_to_ptr.hbm [resolvable:$true] %s13_s8 }
   0x2   :  { %s15_s10 = sshll.u32 %s100_s9, 4  ;;  %s16_s10 = int_to_ptr.vmem [resolvable:$true] %s15_s10 }
   0x3   :  { %18 = dma.hbm_to_vmem [thread:$0]  %s14_s8, 128, %s16_s10, [#allocation3]  }
   0x4   :  { %96 = dma.done.wait [#allocation3], 128  }
   0x5   :  { %97 = vsyncadd [#allocation3], 4294967168  ;;  %s101_s11 = smov [#allocation5]   ;;  %s35_s15 = sshll.u32 %s120_s1, 4  ;;  %vm24_vm0 = vcmask 130048   ;;  %vm26_vm1 = vcmask 261248   ;;  %s36_s15 = int_to_ptr.hbm [resolvable:$true] %s35_s15 }
   0x6   :  { %s33_s12 = sshll.u32 %s101_s11, 4  ;;  %v23_v0 = vld [vmem:[#allocation2] sm:$0xff]  ;;  %v102_v1 = vmov 0.0   ;;  %s34_s12 = int_to_ptr.vmem [resolvable:$true] %s33_s12 }
   0x7   :  { %25 = vst.msk [vmem:[#allocation5] sm:$0xff] %vm24_vm0, %v23_v0 }
   0x8   :  { %27 = vst.msk [vmem:[#allocation5] sm:$0xff] %vm26_vm1, %v102_v1 }
   0x9   :  { %38 = dma.vmem_to_hbm [thread:$0]  %s34_s12, 128, %s36_s15, [#allocation4]  }
   0xa   :  { %98 = dma.done.wait [#allocation4], 128  }
   0xb   :  { %99 = vsyncadd [#allocation4], 4294967168 }
   0xc   :  { %43 = vsyncpa [#allocation3], 1 }
   0xd   :  { %44 = vsyncpa [#allocation4], 1 }

</bundles_post_ra>
